<compile_context>
chip_gen: v5e
topology: v5e:2x2
jax: 0.10.0
libtpu: 0.0.40
codegen_flags: <defaults>
</compile_context>

<pallas_src>
import jax
import jax.numpy as jnp
from jax.experimental import pallas as pl
from jax.experimental.pallas import tpu as pltpu


HIDDEN_PAD = 256  # 200 -> 256: lane aligned; matches v6e/v7x 256x256 MXU.
MIN_TILE = 256    # below this, per-grid-step overhead dominates again.


def _round_up(x, m):
    return (x + m - 1) // m * m


def _default_batch_tile():
    """~1024 rows/step keeps per-step MXU work above the ~0.35 us grid-step
    overhead on v6e/v7x; v5e's slower MXU already hits that knee near 512."""
    try:
        kind = jax.devices()[0].device_kind.lower()
    except Exception:  # pragma: no cover - defensive, host-side only
        return 1024
    if "v5e" in kind or "v5 lite" in kind or "v5lite" in kind:
        return 512
    return 1024


def _choose_tile(B, batch_tile, min_tile=MIN_TILE):
    """Pick the batch tile.

    Big enough to amortize per-grid-step overhead, small enough that large
    batches give >= 2 (preferably an even number of) "parallel" grid steps so
    v7x shards the batch across both TensorCores.
    """
    tile = _round_up(min(batch_tile, _round_up(B, 8)), 8)
    steps = -(-B // tile)
    if steps == 1 and B >= 2 * min_tile:
        # Batch big enough to split: guarantee 2 steps so one v7x TC isn't idle.
        tile = _round_up(-(-B // 2), 8)
    elif steps > 1 and steps % 2 == 1:
        # Odd step count leaves one TC with an extra step; even it out only if
        # the per-step tile stays above the overhead-amortization knee.
        cand = _round_up(-(-B // (steps + 1)), 8)
        if cand >= min_tile:
            tile = cand
    return tile


def _mlp_kernel(x_ref,
                w0_ref, b0_ref,
                w1_ref, b1_ref,
                w2_ref, b2_ref,
                w3_ref, b3_ref,
                w4_ref, b4_ref,
                out_ref):
    """Whole 5-layer MLP for one batch tile, resident in VMEM."""
    # Accepts f32 or bf16 activations; astype is a no-op for bf16 inputs.
    h = x_ref[...].astype(jnp.bfloat16)

    # Layers 0..3: Linear (bf16 MXU inputs, f32 accumulate) + bias + ReLU (f32 VPU).
    # TODO(synk): on v6e/v7x the bias/ReLU path could stay bf16 (bf16 VALU) --
    # only worth it if a bundle dump shows VALU/spill pressure; MXU binds here.
    h = jnp.dot(h, w0_ref[...], preferred_element_type=jnp.float32) + b0_ref[...]
    h = jnp.maximum(h, 0.0)

    h = jnp.dot(h.astype(jnp.bfloat16), w1_ref[...],
                preferred_element_type=jnp.float32) + b1_ref[...]
    h = jnp.maximum(h, 0.0)

    h = jnp.dot(h.astype(jnp.bfloat16), w2_ref[...],
                preferred_element_type=jnp.float32) + b2_ref[...]
    h = jnp.maximum(h, 0.0)

    h = jnp.dot(h.astype(jnp.bfloat16), w3_ref[...],
                preferred_element_type=jnp.float32) + b3_ref[...]
    h = jnp.maximum(h, 0.0)

    # Final layer (output width 1): contract over the hidden dim with the batch
    # landing on lanes (q@k^T-style dot_general: both operands contract their
    # last dim). Result is a lane-dense (1, tile) row stored with unmasked vst,
    # instead of per-row masked (tile, 1) stores.
    row = jax.lax.dot_general(
        w4_ref[...], h.astype(jnp.bfloat16),
        dimension_numbers=(((1,), (1,)), ((), ())),
        preferred_element_type=jnp.float32) + b4_ref[...]          # (1, tile)
    out_ref[...] = row[None].astype(out_ref.dtype)                 # (1, 1, tile)


def prepare_params(params, hidden_pad=HIDDEN_PAD):
    """Pad hidden width to `hidden_pad`, cast MXU-facing weights to bf16.

    params: list of (W, b) with W shaped (in, out), b shaped (out,), all f32.
    Hidden layers get zero-padded to `hidden_pad` (zeros stay zero through
    ReLU, so the math is unchanged). The final layer's weight is stored as a
    (1, hidden_pad) bf16 row for the batch-on-lanes dot_general.
    """
    n = len(params)
    prepared = []
    for li, (w, b) in enumerate(params):
        fan_in, fan_out = w.shape
        in_pad = fan_in if li == 0 else hidden_pad
        if li < n - 1:
            w_p = jnp.zeros((in_pad, hidden_pad), jnp.float32)
            w_p = w_p.at[:fan_in, :fan_out].set(w)
            b_p = jnp.zeros((1, hidden_pad), jnp.float32).at[0, :fan_out].set(b)
            prepared.append((w_p.astype(jnp.bfloat16), b_p))
        else:
            # Final layer (out=1): (1, hidden_pad) row, bias as (1, 1) f32.
            w_row = jnp.zeros((1, in_pad), jnp.float32).at[0, :fan_in].set(w[:, 0])
            b_p = jnp.asarray(b, jnp.float32).reshape(1, 1)
            prepared.append((w_row.astype(jnp.bfloat16), b_p))
    return prepared


def attr_discriminator_forward(x, kernel_params, *, batch_tile=None):
    """x: (B, input_size) f32 or bf16.  kernel_params: prepare_params() output."""
    B, F = x.shape
    if batch_tile is None:
        batch_tile = _default_batch_tile()

    tile = _choose_tile(B, batch_tile)
    B_pad = _round_up(B, tile)
    if B_pad != B:
        x = jnp.pad(x, ((0, B_pad - B), (0, 0)))
    num_tiles = B_pad // tile
    grid = (num_tiles,)

    in_specs = [pl.BlockSpec((tile, F), lambda i: (i, 0))]
    flat = [x]
    for (w, b) in kernel_params:
        # Constant index_map: same block every grid step -> weights are fetched
        # once and held resident instead of re-DMA'd per batch tile.
        in_specs.append(pl.BlockSpec(w.shape, lambda i: (0, 0)))
        in_specs.append(pl.BlockSpec(b.shape, lambda i: (0, 0)))
        flat += [w, b]

    # Lane-dense output: (num_tiles, 1, tile). Block (1, 1, tile) matches the
    # array's full last-two dims, and the last dim (tile) is lane-dense for all
    # multi-step configurations (tile >= MIN_TILE there).
    out = pl.pallas_call(
        _mlp_kernel,
        out_shape=jax.ShapeDtypeStruct((num_tiles, 1, tile), jnp.float32),
        grid_spec=pltpu.PrefetchScalarGridSpec(
            num_scalar_prefetch=0,
            grid=grid,
            in_specs=in_specs,
            out_specs=pl.BlockSpec((1, 1, tile), lambda i: (i, 0, 0)),
        ),
        compiler_params=pltpu.CompilerParams(
            dimension_semantics=("parallel",),
            # Weights (~0.4 MB bf16) + double-buffered x tile + ~1 MB f32
            # intermediates at tile=1024: a few MB total. Keep an explicit
            # 32 MiB cap so tiles tuned on v5e/v6e can't collide with
            # surrounding fusions on v7x's 64 MiB VMEM.
            vmem_limit_bytes=32 * 1024 * 1024,
        ),
    )(*flat)

    # Tile-major flatten matches batch order; padded rows are at the tail.
    return out.reshape(-1)[:B].reshape(B, 1)


def init_params(key, input_size, num_units=200, num_layers=5):
    """PyTorch-Linear-style uniform init. W stored as (in, out), b as (out,)."""
    dims = [input_size] + [num_units] * (num_layers - 1) + [1]
    params = []
    for li in range(num_layers):
        key, kw, kb = jax.random.split(key, 3)
        fan_in, fan_out = dims[li], dims[li + 1]
        scale = 1.0 / jnp.sqrt(jnp.float32(fan_in))
        w = jax.random.uniform(kw, (fan_in, fan_out), jnp.float32, -scale, scale)
        b = jax.random.uniform(kb, (fan_out,), jnp.float32, -scale, scale)
        params.append((w, b))
    return params


def reference_forward(x, params):
    """Pure-JAX f32 reference (unpadded params)."""
    h = x
    for i, (w, b) in enumerate(params):
        h = h @ w + b[None, :]
        if i < len(params) - 1:
            h = jnp.maximum(h, 0.0)
    return h


if __name__ == "__main__":
    key = jax.random.PRNGKey(0)
    input_size, num_units, num_layers = 32, 200, 5

    k_x1, k_x2, k_x3, k_p = jax.random.split(key, 4)
    params = init_params(k_p, input_size, num_units, num_layers)
    kparams = prepare_params(params)

    # Case 1: tiny batch (single grid step, tile == batch).
    x_small = jax.random.normal(k_x1, (8, input_size), jnp.float32)
    out_small = jax.block_until_ready(attr_discriminator_forward(x_small, kparams))
    ref_small = reference_forward(x_small, params)
    assert out_small.shape == (8, 1)
    assert jnp.allclose(out_small, ref_small, atol=5e-2, rtol=5e-2)

    # Case 2: ragged medium batch -> single padded grid step.
    x_med = jax.random.normal(k_x2, (300, input_size), jnp.float32)
    out_med = jax.block_until_ready(attr_discriminator_forward(x_med, kparams))
    ref_med = reference_forward(x_med, params)
    assert out_med.shape == (300, 1)
    assert jnp.allclose(out_med, ref_med, atol=5e-2, rtol=5e-2)

    # Case 3: batch big enough to split -> 2 even "parallel" grid steps,
    # batch padding, and the lane-dense output reshape/slice path.
    x_big = jax.random.normal(k_x3, (650, input_size), jnp.float32)
    out_big = jax.block_until_ready(attr_discriminator_forward(x_big, kparams))
    ref_big = reference_forward(x_big, params)
    assert out_big.shape == (650, 1)
    assert jnp.allclose(out_big, ref_big, atol=5e-2, rtol=5e-2)

    print("KERNEL_OK")
</pallas_src>

<mosaic_0001>
module attributes {stable_mosaic.version = 11 : i64} {
  func.func @_mlp_kernel(%arg0: i32, %arg1: memref<8x32xf32, #tpu.memory_space<vmem>>, %arg2: memref<32x256xbf16, #tpu.memory_space<vmem>>, %arg3: memref<1x256xf32, #tpu.memory_space<vmem>>, %arg4: memref<256x256xbf16, #tpu.memory_space<vmem>>, %arg5: memref<1x256xf32, #tpu.memory_space<vmem>>, %arg6: memref<256x256xbf16, #tpu.memory_space<vmem>>, %arg7: memref<1x256xf32, #tpu.memory_space<vmem>>, %arg8: memref<256x256xbf16, #tpu.memory_space<vmem>>, %arg9: memref<1x256xf32, #tpu.memory_space<vmem>>, %arg10: memref<1x256xbf16, #tpu.memory_space<vmem>>, %arg11: memref<1x1xf32, #tpu.memory_space<vmem>>, %arg12: memref<1x1x8xf32, #tpu.memory_space<vmem>>) attributes {dimension_semantics = [#tpu.dimension_semantics<parallel>], iteration_bounds = array<i64: 1>, scalar_prefetch = 0 : i64, scratch_operands = 0 : i64, tpu.core_type = #tpu.core_type<tc>, window_params = [{transform_indices = @transform_0, window_bounds = array<i64: 8, 32>}, {pipeline_mode = #tpu.pipeline_mode<synchronous>, transform_indices = @transform_1, window_bounds = array<i64: 32, 256>}, {pipeline_mode = #tpu.pipeline_mode<synchronous>, transform_indices = @transform_2, window_bounds = array<i64: 1, 256>}, {pipeline_mode = #tpu.pipeline_mode<synchronous>, transform_indices = @transform_3, window_bounds = array<i64: 256, 256>}, {pipeline_mode = #tpu.pipeline_mode<synchronous>, transform_indices = @transform_4, window_bounds = array<i64: 1, 256>}, {pipeline_mode = #tpu.pipeline_mode<synchronous>, transform_indices = @transform_5, window_bounds = array<i64: 256, 256>}, {pipeline_mode = #tpu.pipeline_mode<synchronous>, transform_indices = @transform_6, window_bounds = array<i64: 1, 256>}, {pipeline_mode = #tpu.pipeline_mode<synchronous>, transform_indices = @transform_7, window_bounds = array<i64: 256, 256>}, {pipeline_mode = #tpu.pipeline_mode<synchronous>, transform_indices = @transform_8, window_bounds = array<i64: 1, 256>}, {pipeline_mode = #tpu.pipeline_mode<synchronous>, transform_indices = @transform_9, window_bounds = array<i64: 1, 256>}, {pipeline_mode = #tpu.pipeline_mode<synchronous>, transform_indices = @transform_10, window_bounds = array<i64: 1, 1>}, {transform_indices = @transform_11, window_bounds = array<i64: 1, 1, 8>}]} {
    %c0 = arith.constant 0 : index
    %c0_0 = arith.constant 0 : index
    %0 = vector.load %arg1[%c0, %c0_0] : memref<8x32xf32, #tpu.memory_space<vmem>>, vector<8x32xf32>
    %1 = arith.truncf %0 : vector<8x32xf32> to vector<8x32xbf16>
    %c0_1 = arith.constant 0 : index
    %c0_2 = arith.constant 0 : index
    %2 = vector.load %arg2[%c0_1, %c0_2] : memref<32x256xbf16, #tpu.memory_space<vmem>>, vector<32x256xbf16>
    %cst = arith.constant dense<0.000000e+00> : vector<8x256xf32>
    %3 = tpu.matmul %1, %2, %cst {dimension_numbers = #tpu.dot_dimension_numbers<[1], [0], [0], [1], [0, 0, 1, 1], [], []>} : vector<8x32xbf16>, vector<32x256xbf16>, vector<8x256xf32> -> vector<8x256xf32>
    %c0_3 = arith.constant 0 : index
    %c0_4 = arith.constant 0 : index
    %4 = vector.load %arg3[%c0_3, %c0_4] : memref<1x256xf32, #tpu.memory_space<vmem>>, vector<1x256xf32>
    %5 = vector.broadcast %4 : vector<1x256xf32> to vector<8x256xf32>
    %6 = arith.addf %3, %5 : vector<8x256xf32>
    %cst_5 = arith.constant 0.000000e+00 : f32
    %7 = vector.broadcast %cst_5 : f32 to vector<8x256xf32>
    %8 = arith.maximumf %6, %7 : vector<8x256xf32>
    %9 = arith.truncf %8 : vector<8x256xf32> to vector<8x256xbf16>
    %c0_6 = arith.constant 0 : index
    %c0_7 = arith.constant 0 : index
    %10 = vector.load %arg4[%c0_6, %c0_7] : memref<256x256xbf16, #tpu.memory_space<vmem>>, vector<256x256xbf16>
    %cst_8 = arith.constant dense<0.000000e+00> : vector<8x256xf32>
    %11 = tpu.matmul %9, %10, %cst_8 {dimension_numbers = #tpu.dot_dimension_numbers<[1], [0], [0], [1], [0, 0, 1, 1], [], []>} : vector<8x256xbf16>, vector<256x256xbf16>, vector<8x256xf32> -> vector<8x256xf32>
    %c0_9 = arith.constant 0 : index
    %c0_10 = arith.constant 0 : index
    %12 = vector.load %arg5[%c0_9, %c0_10] : memref<1x256xf32, #tpu.memory_space<vmem>>, vector<1x256xf32>
    %13 = vector.broadcast %12 : vector<1x256xf32> to vector<8x256xf32>
    %14 = arith.addf %11, %13 : vector<8x256xf32>
    %cst_11 = arith.constant 0.000000e+00 : f32
    %15 = vector.broadcast %cst_11 : f32 to vector<8x256xf32>
    %16 = arith.maximumf %14, %15 : vector<8x256xf32>
    %17 = arith.truncf %16 : vector<8x256xf32> to vector<8x256xbf16>
    %c0_12 = arith.constant 0 : index
    %c0_13 = arith.constant 0 : index
    %18 = vector.load %arg6[%c0_12, %c0_13] : memref<256x256xbf16, #tpu.memory_space<vmem>>, vector<256x256xbf16>
    %cst_14 = arith.constant dense<0.000000e+00> : vector<8x256xf32>
    %19 = tpu.matmul %17, %18, %cst_14 {dimension_numbers = #tpu.dot_dimension_numbers<[1], [0], [0], [1], [0, 0, 1, 1], [], []>} : vector<8x256xbf16>, vector<256x256xbf16>, vector<8x256xf32> -> vector<8x256xf32>
    %c0_15 = arith.constant 0 : index
    %c0_16 = arith.constant 0 : index
    %20 = vector.load %arg7[%c0_15, %c0_16] : memref<1x256xf32, #tpu.memory_space<vmem>>, vector<1x256xf32>
    %21 = vector.broadcast %20 : vector<1x256xf32> to vector<8x256xf32>
    %22 = arith.addf %19, %21 : vector<8x256xf32>
    %cst_17 = arith.constant 0.000000e+00 : f32
    %23 = vector.broadcast %cst_17 : f32 to vector<8x256xf32>
    %24 = arith.maximumf %22, %23 : vector<8x256xf32>
    %25 = arith.truncf %24 : vector<8x256xf32> to vector<8x256xbf16>
    %c0_18 = arith.constant 0 : index
    %c0_19 = arith.constant 0 : index
    %26 = vector.load %arg8[%c0_18, %c0_19] : memref<256x256xbf16, #tpu.memory_space<vmem>>, vector<256x256xbf16>
    %cst_20 = arith.constant dense<0.000000e+00> : vector<8x256xf32>
    %27 = tpu.matmul %25, %26, %cst_20 {dimension_numbers = #tpu.dot_dimension_numbers<[1], [0], [0], [1], [0, 0, 1, 1], [], []>} : vector<8x256xbf16>, vector<256x256xbf16>, vector<8x256xf32> -> vector<8x256xf32>
    %c0_21 = arith.constant 0 : index
    %c0_22 = arith.constant 0 : index
    %28 = vector.load %arg9[%c0_21, %c0_22] : memref<1x256xf32, #tpu.memory_space<vmem>>, vector<1x256xf32>
    %29 = vector.broadcast %28 : vector<1x256xf32> to vector<8x256xf32>
    %30 = arith.addf %27, %29 : vector<8x256xf32>
    %cst_23 = arith.constant 0.000000e+00 : f32
    %31 = vector.broadcast %cst_23 : f32 to vector<8x256xf32>
    %32 = arith.maximumf %30, %31 : vector<8x256xf32>
    %c0_24 = arith.constant 0 : index
    %c0_25 = arith.constant 0 : index
    %33 = vector.load %arg10[%c0_24, %c0_25] : memref<1x256xbf16, #tpu.memory_space<vmem>>, vector<1x256xbf16>
    %34 = arith.truncf %32 : vector<8x256xf32> to vector<8x256xbf16>
    %cst_26 = arith.constant dense<0.000000e+00> : vector<1x8xf32>
    %35 = tpu.matmul %33, %34, %cst_26 {dimension_numbers = #tpu.dot_dimension_numbers<[1], [1], [0], [0], [0, 0, 1, 0], [], []>} : vector<1x256xbf16>, vector<8x256xbf16>, vector<1x8xf32> -> vector<1x8xf32>
    %c0_27 = arith.constant 0 : index
    %c0_28 = arith.constant 0 : index
    %36 = vector.load %arg11[%c0_27, %c0_28] : memref<1x1xf32, #tpu.memory_space<vmem>>, vector<1x1xf32>
    %37 = vector.broadcast %36 : vector<1x1xf32> to vector<1x8xf32>
    %38 = arith.addf %35, %37 : vector<1x8xf32>
    %39 = vector.shape_cast %38 : vector<1x8xf32> to vector<1x1x8xf32>
    %c0_29 = arith.constant 0 : index
    %c0_30 = arith.constant 0 : index
    %c0_31 = arith.constant 0 : index
    %40 = vector.load %arg12[%c0_29, %c0_30, %c0_31] : memref<1x1x8xf32, #tpu.memory_space<vmem>>, vector<1x1x8xf32>
    tpu.vector_store %arg12[%c0_29, %c0_30, %c0_31], %39 {strides = array<i32>} : memref<1x1x8xf32, #tpu.memory_space<vmem>>, vector<1x1x8xf32>,
    return
  }
  func.func @transform_0(%arg0: i32) -> (i32, i32) {
    %c0_i32 = arith.constant 0 : i32
    %c0_i32_0 = arith.constant 0 : i32
    return %arg0, %c0_i32 : i32, i32
  }
  func.func @transform_1(%arg0: i32) -> (i32, i32) {
    %c0_i32 = arith.constant 0 : i32
    %c0_i32_0 = arith.constant 0 : i32
    %c0_i32_1 = arith.constant 0 : i32
    return %c0_i32, %c0_i32_0 : i32, i32
  }
  func.func @transform_2(%arg0: i32) -> (i32, i32) {
    %c0_i32 = arith.constant 0 : i32
    %c0_i32_0 = arith.constant 0 : i32
    %c0_i32_1 = arith.constant 0 : i32
    return %c0_i32, %c0_i32_0 : i32, i32
  }
  func.func @transform_3(%arg0: i32) -> (i32, i32) {
    %c0_i32 = arith.constant 0 : i32
    %c0_i32_0 = arith.constant 0 : i32
    %c0_i32_1 = arith.constant 0 : i32
    return %c0_i32, %c0_i32_0 : i32, i32
  }
  func.func @transform_4(%arg0: i32) -> (i32, i32) {
    %c0_i32 = arith.constant 0 : i32
    %c0_i32_0 = arith.constant 0 : i32
    %c0_i32_1 = arith.constant 0 : i32
    return %c0_i32, %c0_i32_0 : i32, i32
  }
  func.func @transform_5(%arg0: i32) -> (i32, i32) {
    %c0_i32 = arith.constant 0 : i32
    %c0_i32_0 = arith.constant 0 : i32
    %c0_i32_1 = arith.constant 0 : i32
    return %c0_i32, %c0_i32_0 : i32, i32
  }
  func.func @transform_6(%arg0: i32) -> (i32, i32) {
    %c0_i32 = arith.constant 0 : i32
    %c0_i32_0 = arith.constant 0 : i32
    %c0_i32_1 = arith.constant 0 : i32
    return %c0_i32, %c0_i32_0 : i32, i32
  }
  func.func @transform_7(%arg0: i32) -> (i32, i32) {
    %c0_i32 = arith.constant 0 : i32
    %c0_i32_0 = arith.constant 0 : i32
    %c0_i32_1 = arith.constant 0 : i32
    return %c0_i32, %c0_i32_0 : i32, i32
  }
  func.func @transform_8(%arg0: i32) -> (i32, i32) {
    %c0_i32 = arith.constant 0 : i32
    %c0_i32_0 = arith.constant 0 : i32
    %c0_i32_1 = arith.constant 0 : i32
    return %c0_i32, %c0_i32_0 : i32, i32
  }
  func.func @transform_9(%arg0: i32) -> (i32, i32) {
    %c0_i32 = arith.constant 0 : i32
    %c0_i32_0 = arith.constant 0 : i32
    %c0_i32_1 = arith.constant 0 : i32
    return %c0_i32, %c0_i32_0 : i32, i32
  }
  func.func @transform_10(%arg0: i32) -> (i32, i32) {
    %c0_i32 = arith.constant 0 : i32
    %c0_i32_0 = arith.constant 0 : i32
    %c0_i32_1 = arith.constant 0 : i32
    return %c0_i32, %c0_i32_0 : i32, i32
  }
  func.func @transform_11(%arg0: i32) -> (i32, i32, i32) {
    %c0_i32 = arith.constant 0 : i32
    %c0_i32_0 = arith.constant 0 : i32
    %c0_i32_1 = arith.constant 0 : i32
    return %arg0, %c0_i32, %c0_i32_0 : i32, i32, i32
  }
}

</mosaic_0001>

<bundles_post_ra>
// kernel: tpu_custom_call.1
= control target key start
LH: loop header
LB: loop body
LE: loop exit
PB: predicated region body
PF: predicated region fallthrough
CT: control target
= control target key end

     0   :  { %s1778_s0 = inlined_call_operand.hbm [shape: f32[8,32], index: 0, kind: input, shape index: {}]   ;;  %s1779_s1 = inlined_call_operand.hbm [shape: bf16[32,256], index: 1, kind: input, shape index: {}]   ;;  %s1780_s2 = inlined_call_operand.vmem [shape: f32[1,256], index: 2, kind: input, shape index: {}]   ;;  %s1781_s3 = inlined_call_operand.hbm [shape: bf16[256,256], index: 3, kind: input, shape index: {}]   ;;  %s1782_s4 = inlined_call_operand.vmem [shape: f32[1,256], index: 4, kind: input, shape index: {}]   ;;  %s1783_s5 = inlined_call_operand.hbm [shape: bf16[256,256], index: 5, kind: input, shape index: {}]   ;;  %s1784_s6 = inlined_call_operand.vmem [shape: f32[1,256], index: 6, kind: input, shape index: {}]   ;;  %s1785_s7 = inlined_call_operand.hbm [shape: bf16[256,256], index: 7, kind: input, shape index: {}]   ;;  %s1786_s8 = inlined_call_operand.vmem [shape: f32[1,256], index: 8, kind: input, shape index: {}]   ;;  %s1787_s9 = inlined_call_operand.vmem [shape: bf16[1,256], index: 9, kind: input, shape index: {}]   ;;  %s1788_s10 = inlined_call_operand.<no memory space> [shape: f32[1,1], index: 10, kind: input, shape index: {}]   ;;  %s1789_s11 = inlined_call_operand.hbm [shape: f32[1,1,8], index: 11, kind: output, shape index: {}]  }
   0x1   :  { %v16_v0 = vstv %s1788_s10 }
   0x2   :  { %17 = vst [vmem:[#allocation2] sm:$0x1] %v16_v0 }
   0x3   :  { %18 = vsyncpa [#allocation4], 0 }
   0x4   :  { %19 = vsyncpa [#allocation7], 0 }
   0x5   :  { %20 = vsyncpa [#allocation10], 0  ;;  %s37_s21 = sshll.u32 %s1779_s1, 4  ;;  %s38_s21 = int_to_ptr.hbm [resolvable:$true] %s37_s21 }
   0x6   :  { %21 = vsyncpa [#allocation5], 0  ;;  %s1671_s22 = smov [#allocation6]   ;;  %s67_s26 = sshll.u32 %s1783_s5, 4  ;;  %s68_s26 = int_to_ptr.hbm [resolvable:$true] %s67_s26 }
   0x7   :  { %s39_s23 = sshll.u32 %s1671_s22, 4  ;;  %s1672_s27 = smov 128   ;;  %s40_s23 = int_to_ptr.vmem [resolvable:$true] %s39_s23 }
   0x8   :  { %s1673_s28 = smov 8   ;;  %s1674_s10 = smov [#allocation9]  }
   0x9   :  { %45 = dma.hbm_to_vmem [thread:$0]  %s38_s21, 512, %s40_s23, [#allocation7], %s1672_s27, %s1672_s27, %s1673_s28  }
   0xa   :  { %s69_s29 = sshll.u32 %s1674_s10, 4  ;;  %s27_s13 = sshll.u32 %s1778_s0, 4  ;;  %s70_s29 = int_to_ptr.vmem [resolvable:$true] %s69_s29  ;;  %s28_s13 = int_to_ptr.hbm [resolvable:$true] %s27_s13 }
   0xb   :  { %75 = dma.hbm_to_vmem [thread:$0]  %s68_s26, 4096, %s70_s29, [#allocation10], %s1672_s27, %s1672_s27, %s1673_s28  }
   0xc   :  { %s52_s15 = sshll.u32 %s1781_s3, 4  ;;  %s1675_s16 = smov [#allocation3]   ;;  %s53_s15 = int_to_ptr.hbm [resolvable:$true] %s52_s15 }
   0xd   :  { %s29_s17 = sshll.u32 %s1675_s16, 4  ;;  %s1676_s5 = smov [#allocation8]   ;;  %s30_s17 = int_to_ptr.vmem [resolvable:$true] %s29_s17 }
   0xe   :  { %32 = dma.hbm_to_vmem [thread:$0]  %s28_s13, 128, %s30_s17, [#allocation4]  }
   0xf   :  { %s54_s18 = sshll.u32 %s1676_s5, 4  ;;  %s82_s21 = sshll.u32 %s1785_s7, 4  ;;  %s55_s18 = int_to_ptr.vmem [resolvable:$true] %s54_s18  ;;  %s83_s21 = int_to_ptr.hbm [resolvable:$true] %s82_s21 }
  0x10   :  { %60 = dma.hbm_to_vmem [thread:$0]  %s53_s15, 4096, %s55_s18, [#allocation7], %s1672_s27, %s1672_s27, %s1673_s28  }
  0x11   :  { %s1677_s0 = smov [#allocation11]  }
  0x12   :  { %s84_s22 = sshll.u32 %s1677_s0, 4  ;;  %s85_s22 = int_to_ptr.vmem [resolvable:$true] %s84_s22 }
  0x13   :  { %90 = dma.hbm_to_vmem [thread:$0]  %s83_s21, 4096, %s85_s22, [#allocation10], %s1672_s27, %s1672_s27, %s1673_s28  }
  0x14   :  { %1663 = dma.done.wait [#allocation4], 128  }
  0x15   :  { %1664 = vsyncadd [#allocation4], 4294967168 }
  0x16   :  { %1665 = dma.done.wait [#allocation7], 4608  }
  0x17   :  { %1666 = vsyncadd [#allocation7], 4294962688 }
  0x18   :  { %1667 = dma.done.wait [#allocation10], 8192  }
  0x19   :  { %1668 = vsyncadd [#allocation10], 4294959104  ;;  %v1017_v1 = vld [vmem:[#allocation6 + $0x10] sm:$0xf]  ;;  %v1412_v2 = vld [vmem:[#allocation6 + $0x14] sm:$0xf0] }
  0x1a   :  { %v1411_v3 = vld [vmem:[#allocation6 + $0x14] sm:$0xf]  ;;  %v1018_v4 = vor.u32 %v1412_v2, %v1017_v1  ;;  %v1019_v5 = vld [vmem:[#allocation6 + $0x18] sm:$0xf0]  ;;  %v1009_v6 = vld [vmem:[#allocation6] sm:$0xf] }
  0x1b   :  { %v1410_v7 = vld [vmem:[#allocation6 + $0x4] sm:$0xf0]  ;;  %v1022_v8 = vor.u32 %v1411_v3, %v1019_v5  ;;  %v1409_v9 = vld [vmem:[#allocation6 + $0x4] sm:$0xf]  ;;  %v1011_v10 = vld [vmem:[#allocation6 + $0x8] sm:$0xf0] }
  0x1c   :  { %v118_v11 = vld [vmem:[#allocation3] sm:$0xff]  ;;  %vm150_vm0 = vcmask 261120   ;;  %160 = vmatpush.bf16.msra.mxu0 %v1018_v4  ;;  %v1010_v12 = vor.u32 %v1410_v7, %v1009_v6  ;;  %v1083_v13 = vld [vmem:[#allocation8 + $0x70] sm:$0xf]  ;;  %v1014_v16 = vor.u32 %v1409_v9, %v1011_v10  ;;  %v1427_v19 = vld [vmem:[#allocation8 + $0x74] sm:$0xf] }
  0x1d   :  { %v1428_v14 = vld [vmem:[#allocation8 + $0x74] sm:$0xf0]  ;;  %v1147_v15 = vld [vmem:[#allocation8 + $0xf0] sm:$0xf]  ;;  %173 = vmatpush.bf16.msra.mxu1 %v1022_v8  ;;  %v1085_v20 = vld [vmem:[#allocation8 + $0x78] sm:$0xf0]  ;;  %v119_v26 = vpack.c.bf16 %v118_v11, %v118_v11 }
  0x1e   :  { %v1084_v17 = vor.u32 %v1428_v14, %v1083_v13  ;;  %v1444_v18 = vld [vmem:[#allocation8 + $0xf4] sm:$0xf0]  ;;  %v1088_v22 = vor.u32 %v1427_v19, %v1085_v20  ;;  %v1443_v23 = vld [vmem:[#allocation8 + $0xf4] sm:$0xf]  ;;  %v1149_v24 = vld [vmem:[#allocation8 + $0xf8] sm:$0xf0] }
  0x1f   :  { %v1148_v21 = vor.u32 %v1444_v18, %v1147_v15  ;;  %v1075_v25 = vld [vmem:[#allocation8 + $0x60] sm:$0xf]  ;;  %v1152_v27 = vor.u32 %v1443_v23, %v1149_v24  ;;  %v1426_v28 = vld [vmem:[#allocation8 + $0x64] sm:$0xf0]  ;;  %v1425_v33 = vld [vmem:[#allocation8 + $0x64] sm:$0xf] }
  0x20   :  { %382 = vmatpush.bf16.msra.mxu2 %v1084_v17  ;;  %v1139_v29 = vld [vmem:[#allocation8 + $0xe0] sm:$0xf]  ;;  %v1442_v30 = vld [vmem:[#allocation8 + $0xe4] sm:$0xf0]  ;;  %161 = vmatpush.bf16.msra.mxu0 %v1010_v12  ;;  %v1076_v31 = vor.u32 %v1426_v28, %v1075_v25  ;;  %v1077_v34 = vld [vmem:[#allocation8 + $0x68] sm:$0xf0] }
  0x21   :  { %395 = vmatpush.bf16.msra.mxu3 %v1148_v21  ;;  %v1140_v32 = vor.u32 %v1442_v30, %v1139_v29  ;;  %v1441_v35 = vld [vmem:[#allocation8 + $0xe4] sm:$0xf]  ;;  %174 = vmatpush.bf16.msra.mxu1 %v1014_v16  ;;  %v1080_v36 = vor.u32 %v1425_v33, %v1077_v34  ;;  %v1141_v37 = vld [vmem:[#allocation8 + $0xe8] sm:$0xf0]  ;;  %v1067_v38 = vld [vmem:[#allocation8 + $0x50] sm:$0xf] }
  0x22   :  { %v1424_v39 = vld [vmem:[#allocation8 + $0x54] sm:$0xf0]  ;;  %v1144_v40 = vor.u32 %v1441_v35, %v1141_v37  ;;  %v1131_v41 = vld [vmem:[#allocation8 + $0xd0] sm:$0xf]  ;;  %v1423_v43 = vld [vmem:[#allocation8 + $0x54] sm:$0xf] }
  0x23   :  { %v1440_v42 = vld [vmem:[#allocation8 + $0xd4] sm:$0xf0]  ;;  %1023 = vmatmul.msk.bf16.vlgmr.msra.gmra.mxu0 %vm150_vm0, %v119_v26  ;;  %v1068_v44 = vor.u32 %v1424_v39, %v1067_v38  ;;  %v1069_v45 = vld [vmem:[#allocation8 + $0x58] sm:$0xf0]  ;;  %v1439_v46 = vld [vmem:[#allocation8 + $0xd4] sm:$0xf] }
  0x24   :  { %408 = vmatpush.bf16.msrb.mxu0 %v1088_v22  ;;  %383 = vmatpush.bf16.msra.mxu2 %v1076_v31  ;;  %v1133_v47 = vld [vmem:[#allocation8 + $0xd8] sm:$0xf0]  ;;  %v1132_v48 = vor.u32 %v1440_v42, %v1131_v41  ;;  %v1059_v49 = vld [vmem:[#allocation8 + $0x40] sm:$0xf]  ;;  %v1422_v50 = vld [vmem:[#allocation8 + $0x44] sm:$0xf0]  ;;  %v1072_v51 = vor.u32 %v1423_v43, %v1069_v45 }
  0x25   :  { %421 = vmatpush.bf16.msrb.mxu1 %v1152_v27  ;;  %396 = vmatpush.bf16.msra.mxu3 %v1140_v32  ;;  %v1123_v52 = vld [vmem:[#allocation8 + $0xc0] sm:$0xf]  ;;  %v1438_v53 = vld [vmem:[#allocation8 + $0xc4] sm:$0xf0]  ;;  %v1136_v54 = vor.u32 %v1439_v46, %v1133_v47  ;;  %v1421_v55 = vld [vmem:[#allocation8 + $0x44] sm:$0xf]  ;;  %v1060_v57 = vor.u32 %v1422_v50, %v1059_v49 }
  0x26   :  { %1024 = vmatmul.msk.bf16.vlgmr.msra.gmra.mxu1 %vm150_vm0, %v119_v26  ;;  %v1061_v56 = vld [vmem:[#allocation8 + $0x48] sm:$0xf0]  ;;  %v1437_v58 = vld [vmem:[#allocation8 + $0xc4] sm:$0xf]  ;;  %v1124_v60 = vor.u32 %v1438_v53, %v1123_v52  ;;  %v1051_v61 = vld [vmem:[#allocation8 + $0x30] sm:$0xf] }
  0x27   :  { %v1125_v59 = vld [vmem:[#allocation8 + $0xc8] sm:$0xf0]  ;;  %v1420_v62 = vld [vmem:[#allocation8 + $0x34] sm:$0xf0]  ;;  %v1064_v63 = vor.u32 %v1421_v55, %v1061_v56  ;;  %v1115_v0 = vld [vmem:[#allocation8 + $0xb0] sm:$0xf] }
  0x28   :  { %409 = vmatpush.bf16.msrb.mxu0 %v1080_v36  ;;  %384 = vmatpush.bf16.msra.mxu2 %v1068_v44  ;;  %v1436_v1 = vld [vmem:[#allocation8 + $0xb4] sm:$0xf0]  ;;  %v1128_v2 = vor.u32 %v1437_v58, %v1125_v59  ;;  %v1419_v3 = vld [vmem:[#allocation8 + $0x34] sm:$0xf]  ;;  %v1053_v4 = vld [vmem:[#allocation8 + $0x38] sm:$0xf0]  ;;  %v1052_v5 = vor.u32 %v1420_v62, %v1051_v61 }
  0x29   :  { %422 = vmatpush.bf16.msrb.mxu1 %v1144_v40  ;;  %397 = vmatpush.bf16.msra.mxu3 %v1132_v48  ;;  %v1435_v6 = vld [vmem:[#allocation8 + $0xb4] sm:$0xf]  ;;  %v1117_v7 = vld [vmem:[#allocation8 + $0xb8] sm:$0xf0]  ;;  %v1116_v8 = vor.u32 %v1436_v1, %v1115_v0  ;;  %v1043_v9 = vld [vmem:[#allocation8 + $0x20] sm:$0xf]  ;;  %v1056_v11 = vor.u32 %v1419_v3, %v1053_v4 }
  0x2a   :  { %v1418_v10 = vld [vmem:[#allocation8 + $0x24] sm:$0xf0]  ;;  %v1107_v12 = vld [vmem:[#allocation8 + $0xa0] sm:$0xf]  ;;  %v1120_v14 = vor.u32 %v1435_v6, %v1117_v7  ;;  %v1417_v15 = vld [vmem:[#allocation8 + $0x24] sm:$0xf] }
  0x2b   :  { %v1434_v13 = vld [vmem:[#allocation8 + $0xa4] sm:$0xf0]  ;;  %v1045_v16 = vld [vmem:[#allocation8 + $0x28] sm:$0xf0]  ;;  %v1044_v17 = vor.u32 %v1418_v10, %v1043_v9  ;;  %v1433_v18 = vld [vmem:[#allocation8 + $0xa4] sm:$0xf] }
  0x2c   :  { %410 = vmatpush.bf16.msrb.mxu0 %v1072_v51  ;;  %385 = vmatpush.bf16.msra.mxu2 %v1060_v57  ;;  %v1109_v19 = vld [vmem:[#allocation8 + $0xa8] sm:$0xf0]  ;;  %v1108_v20 = vor.u32 %v1434_v13, %v1107_v12  ;;  %v1048_v21 = vor.u32 %v1417_v15, %v1045_v16  ;;  %v1035_v23 = vld [vmem:[#allocation8 + $0x10] sm:$0xf]  ;;  %v1416_v24 = vld [vmem:[#allocation8 + $0x14] sm:$0xf0] }
  0x2d   :  { %423 = vmatpush.bf16.msrb.mxu1 %v1136_v54  ;;  %398 = vmatpush.bf16.msra.mxu3 %v1124_v60  ;;  %v1112_v22 = vor.u32 %v1433_v18, %v1109_v19  ;;  %v1099_v25 = vld [vmem:[#allocation8 + $0x90] sm:$0xf]  ;;  %v1036_v26 = vor.u32 %v1416_v24, %v1035_v23  ;;  %v1432_v27 = vld [vmem:[#allocation8 + $0x94] sm:$0xf0]  ;;  %v1415_v28 = vld [vmem:[#allocation8 + $0x14] sm:$0xf] }
  0x2e   :  { %v1037_v29 = vld [vmem:[#allocation8 + $0x18] sm:$0xf0]  ;;  %v1100_v30 = vor.u32 %v1432_v27, %v1099_v25  ;;  %v1431_v32 = vld [vmem:[#allocation8 + $0x94] sm:$0xf]  ;;  %v1027_v35 = vld [vmem:[#allocation8] sm:$0xf] }
  0x2f   :  { %v1040_v31 = vor.u32 %v1415_v28, %v1037_v29  ;;  %v1101_v33 = vld [vmem:[#allocation8 + $0x98] sm:$0xf0]  ;;  %v1414_v36 = vld [vmem:[#allocation8 + $0x4] sm:$0xf0]  ;;  %v1091_v37 = vld [vmem:[#allocation8 + $0x80] sm:$0xf] }
  0x30   :  { %411 = vmatpush.bf16.msrb.mxu0 %v1064_v63  ;;  %386 = vmatpush.bf16.msra.mxu2 %v1052_v5  ;;  %v1104_v34 = vor.u32 %v1431_v32, %v1101_v33  ;;  %v1028_v38 = vor.u32 %v1414_v36, %v1027_v35  ;;  %v1430_v39 = vld [vmem:[#allocation8 + $0x84] sm:$0xf0]  ;;  %v1413_v40 = vld [vmem:[#allocation8 + $0x4] sm:$0xf]  ;;  %v1029_v41 = vld [vmem:[#allocation8 + $0x8] sm:$0xf0] }
  0x31   :  { %424 = vmatpush.bf16.msrb.mxu1 %v1128_v2  ;;  %399 = vmatpush.bf16.msra.mxu3 %v1116_v8  ;;  %v1092_v42 = vor.u32 %v1430_v39, %v1091_v37  ;;  %v1032_v43 = vor.u32 %v1413_v40, %v1029_v41  ;;  %v1429_v44 = vld [vmem:[#allocation8 + $0x84] sm:$0xf]  ;;  %v1093_v45 = vld [vmem:[#allocation8 + $0x88] sm:$0xf0]  ;;  %v1275_v47 = vld [vmem:[#allocation9 + $0xf0] sm:$0xf] }
  0x32   :  { %v1096_v46 = vor.u32 %v1429_v44, %v1093_v45  ;;  %v1476_v48 = vld [vmem:[#allocation9 + $0xf4] sm:$0xf0]  ;;  %v1475_v49 = vld [vmem:[#allocation9 + $0xf4] sm:$0xf]  ;;  %v1277_v51 = vld [vmem:[#allocation9 + $0xf8] sm:$0xf0] }
  0x33   :  { %v1276_v50 = vor.u32 %v1476_v48, %v1275_v47  ;;  %v1267_v52 = vld [vmem:[#allocation9 + $0xe0] sm:$0xf]  ;;  %v1474_v53 = vld [vmem:[#allocation9 + $0xe4] sm:$0xf0]  ;;  %v1280_v54 = vor.u32 %v1475_v49, %v1277_v51  ;;  %v1473_v55 = vld [vmem:[#allocation9 + $0xe4] sm:$0xf] }
  0x34   :  { %412 = vmatpush.bf16.msrb.mxu0 %v1056_v11  ;;  %387 = vmatpush.bf16.msra.mxu2 %v1044_v17  ;;  %v1269_v56 = vld [vmem:[#allocation9 + $0xe8] sm:$0xf0]  ;;  %v1211_v57 = vld [vmem:[#allocation9 + $0x70] sm:$0xf]  ;;  %v1268_v58 = vor.u32 %v1474_v53, %v1267_v52  ;;  %v1460_v59 = vld [vmem:[#allocation9 + $0x74] sm:$0xf0] }
  0x35   :  { %425 = vmatpush.bf16.msrb.mxu1 %v1120_v14  ;;  %400 = vmatpush.bf16.msra.mxu3 %v1108_v20  ;;  %v1459_v60 = vld [vmem:[#allocation9 + $0x74] sm:$0xf]  ;;  %v1213_v61 = vld [vmem:[#allocation9 + $0x78] sm:$0xf0]  ;;  %v1272_v62 = vor.u32 %v1473_v55, %v1269_v56  ;;  %v1212_v63 = vor.u32 %v1460_v59, %v1211_v57  ;;  %v1259_v1 = vld [vmem:[#allocation9 + $0xd0] sm:$0xf] }
  0x36   :  { %v1216_v0 = vor.u32 %v1459_v60, %v1213_v61  ;;  %v1472_v2 = vld [vmem:[#allocation9 + $0xd4] sm:$0xf0]  ;;  %v1471_v3 = vld [vmem:[#allocation9 + $0xd4] sm:$0xf]  ;;  %v1261_v4 = vld [vmem:[#allocation9 + $0xd8] sm:$0xf0] }
  0x37   :  { %v1203_v5 = vld [vmem:[#allocation9 + $0x60] sm:$0xf]  ;;  %v1458_v6 = vld [vmem:[#allocation9 + $0x64] sm:$0xf0]  ;;  %v1457_v8 = vld [vmem:[#allocation9 + $0x64] sm:$0xf]  ;;  %v1260_v10 = vor.u32 %v1472_v2, %v1259_v1  ;;  %v1264_v14 = vor.u32 %v1471_v3, %v1261_v4 }
  0x38   :  { %413 = vmatpush.bf16.msrb.mxu0 %v1048_v21  ;;  %388 = vmatpush.bf16.msra.mxu2 %v1036_v26  ;;  %v1204_v7 = vor.u32 %v1458_v6, %v1203_v5  ;;  %v1205_v9 = vld [vmem:[#allocation9 + $0x68] sm:$0xf0]  ;;  %v1251_v12 = vld [vmem:[#allocation9 + $0xc0] sm:$0xf]  ;;  %v1470_v13 = vld [vmem:[#allocation9 + $0xc4] sm:$0xf0] }
  0x39   :  { %426 = vmatpush.bf16.msrb.mxu1 %v1112_v22  ;;  %401 = vmatpush.bf16.msra.mxu3 %v1100_v30  ;;  %v1208_v11 = vor.u32 %v1457_v8, %v1205_v9  ;;  %v1195_v15 = vld [vmem:[#allocation9 + $0x50] sm:$0xf]  ;;  %v1456_v16 = vld [vmem:[#allocation9 + $0x54] sm:$0xf0]  ;;  %v1455_v17 = vld [vmem:[#allocation9 + $0x54] sm:$0xf]  ;;  %v1252_v24 = vor.u32 %v1470_v13, %v1251_v12 }
  0x3a   :  { %v1469_v18 = vld [vmem:[#allocation9 + $0xc4] sm:$0xf]  ;;  %v1253_v19 = vld [vmem:[#allocation9 + $0xc8] sm:$0xf0]  ;;  %v1197_v20 = vld [vmem:[#allocation9 + $0x58] sm:$0xf0]  ;;  %v1196_v21 = vor.u32 %v1456_v16, %v1195_v15 }
  0x3b   :  { %v1200_v22 = vor.u32 %v1455_v17, %v1197_v20  ;;  %v1187_v23 = vld [vmem:[#allocation9 + $0x40] sm:$0xf]  ;;  %v1454_v25 = vld [vmem:[#allocation9 + $0x44] sm:$0xf0]  ;;  %v1453_v26 = vld [vmem:[#allocation9 + $0x44] sm:$0xf]  ;;  %v1256_v28 = vor.u32 %v1469_v18, %v1253_v19 }
  0x3c   :  { %414 = vmatpush.bf16.msrb.mxu0 %v1040_v31  ;;  %389 = vmatpush.bf16.msra.mxu2 %v1028_v38  ;;  %v1189_v27 = vld [vmem:[#allocation9 + $0x48] sm:$0xf0]  ;;  %v1243_v29 = vld [vmem:[#allocation9 + $0xb0] sm:$0xf]  ;;  %v1468_v30 = vld [vmem:[#allocation9 + $0xb4] sm:$0xf0]  ;;  %v1188_v33 = vor.u32 %v1454_v25, %v1187_v23 }
  0x3d   :  { %427 = vmatpush.bf16.msrb.mxu1 %v1104_v34  ;;  %402 = vmatpush.bf16.msra.mxu3 %v1092_v42  ;;  %v1467_v31 = vld [vmem:[#allocation9 + $0xb4] sm:$0xf]  ;;  %v1245_v32 = vld [vmem:[#allocation9 + $0xb8] sm:$0xf0]  ;;  %v1192_v34 = vor.u32 %v1453_v26, %v1189_v27  ;;  %v1244_v35 = vor.u32 %v1468_v30, %v1243_v29  ;;  %v1235_v37 = vld [vmem:[#allocation9 + $0xa0] sm:$0xf] }
  0x3e   :  { %v1248_v36 = vor.u32 %v1467_v31, %v1245_v32  ;;  %v1466_v38 = vld [vmem:[#allocation9 + $0xa4] sm:$0xf0]  ;;  %v124_v39 = vld [vmem:[%s1780_s2] sm:$0x3]  ;;  %v1465_v40 = vld [vmem:[#allocation9 + $0xa4] sm:$0xf] }
  0x3f   :  { %v1237_v41 = vld [vmem:[#allocation9 + $0xa8] sm:$0xf0]  ;;  %v1236_v42 = vor.u32 %v1466_v38, %v1235_v37  ;;  %v127_v45 = vperm.slane %v124_v39, 1  ;;  %v1179_v56 = vld [vmem:[#allocation9 + $0x30] sm:$0xf]  ;;  %s995_s29 = sshll.u32 %s1789_s11, 4  ;;  %s996_s29 = int_to_ptr.hbm [resolvable:$true] %s995_s29 }
  0x40   :  { %415 = vmatpush.bf16.msrb.mxu0 %v1032_v43  ;;  %636 = vmatpush.bf16.msrb.mxu2 %v1212_v63  ;;  %v126_v43 = vperm.slane %v124_v39, 0  ;;  %v1240_v44 = vor.u32 %v1465_v40, %v1237_v41  ;;  %v1452_v57 = vld [vmem:[#allocation9 + $0x34] sm:$0xf0]  ;;  %v1181_v60 = vld [vmem:[#allocation9 + $0x38] sm:$0xf0]  ;;  %vm986_vm1 = vcmask 57344  }
  0x41   :  { %428 = vmatpush.bf16.msrb.mxu1 %v1096_v46  ;;  %649 = vmatpush.bf16.msrb.mxu3 %v1276_v50  ;;  %v1180_v59 = vor.u32 %v1452_v57, %v1179_v56  ;;  %v1464_v63 = vld [vmem:[#allocation9 + $0x94] sm:$0xf0]  ;;  %v1229_v2 = vld [vmem:[#allocation9 + $0x98] sm:$0xf0]  ;;  %v1171_v4 = vld [vmem:[#allocation9 + $0x20] sm:$0xf] }
  0x42   :  { %v1450_v5 = vld [vmem:[#allocation9 + $0x24] sm:$0xf0]  ;;  %v1449_v6 = vld [vmem:[#allocation9 + $0x24] sm:$0xf]  ;;  %v1173_v8 = vld [vmem:[#allocation9 + $0x28] sm:$0xf0] }
  0x43   :  { %v1176_v9 = vor.u32 %v1449_v6, %v1173_v8  ;;  %v1461_v12 = vld [vmem:[#allocation9 + $0x84] sm:$0xf]  ;;  %v1163_v16 = vld [vmem:[#allocation9 + $0x10] sm:$0xf]  ;;  %v1448_v17 = vld [vmem:[#allocation9 + $0x14] sm:$0xf0] }
  0x44   :  { %662 = vmatpush.bf16.msra.mxu0 %v1216_v0  ;;  %637 = vmatpush.bf16.msrb.mxu2 %v1204_v7  ;;  %v1463_v0 = vld [vmem:[#allocation9 + $0x94] sm:$0xf]  ;;  %v1172_v7 = vor.u32 %v1450_v5, %v1171_v4  ;;  %v1164_v18 = vor.u32 %v1448_v17, %v1163_v16  ;;  %v1165_v20 = vld [vmem:[#allocation9 + $0x18] sm:$0xf0]  ;;  %v1446_v23 = vld [vmem:[#allocation9 + $0x4] sm:$0xf0] }
  0x45   :  { %675 = vmatpush.bf16.msra.mxu1 %v1280_v54  ;;  %650 = vmatpush.bf16.msrb.mxu3 %v1268_v58  ;;  %v1451_v58 = vld [vmem:[#allocation9 + $0x34] sm:$0xf]  ;;  %v1232_v3 = vor.u32 %v1463_v0, %v1229_v2  ;;  %v1157_v26 = vld [vmem:[#allocation9 + $0x8] sm:$0xf0]  ;;  %v1508_v29 = vld [vmem:[#allocation11 + $0xf4] sm:$0xf0] }
  0x46   :  { %v1184_v61 = vor.u32 %v1451_v58, %v1181_v60  ;;  %v1447_v19 = vld [vmem:[#allocation9 + $0x14] sm:$0xf]  ;;  %v1405_v32 = vld [vmem:[#allocation11 + $0xf8] sm:$0xf0]  ;;  %v1397_v37 = vld [vmem:[#allocation11 + $0xe8] sm:$0xf0] }
  0x47   :  { %v1507_v30 = vld [vmem:[#allocation11 + $0xf4] sm:$0xf]  ;;  %v1339_v38 = vld [vmem:[#allocation11 + $0x70] sm:$0xf]  ;;  %v1492_v40 = vld [vmem:[#allocation11 + $0x74] sm:$0xf0] }
  0x48   :  { %663 = vmatpush.bf16.msra.mxu0 %v1208_v11  ;;  %638 = vmatpush.bf16.msrb.mxu2 %v1196_v21  ;;  %v1462_v11 = vld [vmem:[#allocation9 + $0x84] sm:$0xf0]  ;;  %v1168_v21 = vor.u32 %v1447_v19, %v1165_v20  ;;  %v1491_v41 = vld [vmem:[#allocation11 + $0x74] sm:$0xf]  ;;  %v1379_v57 = vld [vmem:[#allocation11 + $0xc0] sm:$0xf] }
  0x49   :  { %676 = vmatpush.bf16.msra.mxu1 %v1272_v62  ;;  %651 = vmatpush.bf16.msrb.mxu3 %v1260_v10  ;;  %v1227_v62 = vld [vmem:[#allocation9 + $0x90] sm:$0xf]  ;;  %v1219_v10 = vld [vmem:[#allocation9 + $0x80] sm:$0xf]  ;;  %v1502_v58 = vld [vmem:[#allocation11 + $0xc4] sm:$0xf0] }
  0x4a   :  { %v1228_v1 = vor.u32 %v1464_v63, %v1227_v62  ;;  %v1220_v13 = vor.u32 %v1462_v11, %v1219_v10  ;;  %v1323_v60 = vld [vmem:[#allocation11 + $0x50] sm:$0xf]  ;;  %v1487_v62 = vld [vmem:[#allocation11 + $0x54] sm:$0xf]  ;;  %v1501_v63 = vld [vmem:[#allocation11 + $0xc4] sm:$0xf]  ;;  %v1380_v5 = vor.u32 %v1502_v58, %v1379_v57 }
  0x4b   :  { %v1381_v0 = vld [vmem:[#allocation11 + $0xc8] sm:$0xf0]  ;;  %v1481_v57 = vld [vmem:[#allocation11 + $0x24] sm:$0xf] }
  0x4c   :  { %664 = vmatpush.bf16.msra.mxu0 %v1200_v22  ;;  %639 = vmatpush.bf16.msrb.mxu2 %v1188_v33  ;;  %v1155_v22 = vld [vmem:[#allocation9] sm:$0xf]  ;;  %v216_v4 = vld [vmem:[%s1782_s4] sm:$0x3]  ;;  %v1384_v6 = vor.u32 %v1501_v63, %v1381_v0  ;;  %v1493_v63 = vld [vmem:[#allocation11 + $0x84] sm:$0xf] }
  0x4d   :  { %677 = vmatpush.bf16.msra.mxu1 %v1264_v14  ;;  %652 = vmatpush.bf16.msrb.mxu3 %v1252_v24  ;;  %v1221_v14 = vld [vmem:[#allocation9 + $0x88] sm:$0xf0]  ;;  %v1445_v24 = vld [vmem:[#allocation9 + $0x4] sm:$0xf]  ;;  %v1156_v25 = vor.u32 %v1446_v23, %v1155_v22  ;;  %v1395_v33 = vld [vmem:[#allocation11 + $0xe0] sm:$0xf] }
  0x4e   :  { %v1224_v15 = vor.u32 %v1461_v12, %v1221_v14  ;;  %v1160_v27 = vor.u32 %v1445_v24, %v1157_v26  ;;  %v218_v12 = vperm.slane %v216_v4, 0  ;;  %v1500_v26 = vld [vmem:[#allocation11 + $0xb4] sm:$0xf0] }
  0x50   :  { %665 = vmatpush.bf16.msra.mxu0 %v1192_v34  ;;  %640 = vmatpush.bf16.msrb.mxu2 %v1180_v59  ;;  %v1506_v34 = vld [vmem:[#allocation11 + $0xe4] sm:$0xf0] }
  0x51   :  { %678 = vmatpush.bf16.msra.mxu1 %v1256_v28  ;;  %653 = vmatpush.bf16.msrb.mxu3 %v1244_v35  ;;  %v1403_v28 = vld [vmem:[#allocation11 + $0xf0] sm:$0xf]  ;;  %v1408_v35 = vor.u32 %v1507_v30, %v1405_v32  ;;  %v1396_v39 = vor.u32 %v1506_v34, %v1395_v33  ;;  %v1486_v32 = vld [vmem:[#allocation11 + $0x44] sm:$0xf0]  ;;  %v1485_v33 = vld [vmem:[#allocation11 + $0x44] sm:$0xf] }
  0x52   :  { %v1404_v31 = vor.u32 %v1508_v29, %v1403_v28  ;;  %v1373_v29 = vld [vmem:[#allocation11 + $0xb8] sm:$0xf0] }
  0x54   :  { %666 = vmatpush.bf16.msra.mxu0 %v1184_v61  ;;  %641 = vmatpush.bf16.msrb.mxu2 %v1172_v7  ;;  %v1488_v61 = vld [vmem:[#allocation11 + $0x54] sm:$0xf0]  ;;  %v219_v7 = vperm.slane %v216_v4, 1 }
  0x55   :  { %679 = vmatpush.bf16.msra.mxu1 %v1248_v36  ;;  %654 = vmatpush.bf16.msrb.mxu3 %v1236_v42  ;;  %v1505_v36 = vld [vmem:[#allocation11 + $0xe4] sm:$0xf]  ;;  %v1341_v42 = vld [vmem:[#allocation11 + $0x78] sm:$0xf0]  ;;  %v1324_v2 = vor.u32 %v1488_v61, %v1323_v60  ;;  %v1347_v61 = vld [vmem:[#allocation11 + $0x80] sm:$0xf] }
  0x56   :  { %v1480_v4 = vld [vmem:[#allocation11 + $0x14] sm:$0xf0] }
  0x58   :  { %667 = vmatpush.bf16.msra.mxu0 %v1176_v9  ;;  %642 = vmatpush.bf16.msrb.mxu2 %v1164_v18 }
  0x59   :  { %680 = vmatpush.bf16.msra.mxu1 %v1240_v44  ;;  %655 = vmatpush.bf16.msrb.mxu3 %v1228_v1  ;;  %v1340_v44 = vor.u32 %v1492_v40, %v1339_v38  ;;  %v1325_v1 = vld [vmem:[#allocation11 + $0x58] sm:$0xf0]  ;;  %v1497_v40 = vld [vmem:[#allocation11 + $0xa4] sm:$0xf] }
  0x5c   :  { %668 = vmatpush.bf16.msra.mxu0 %v1168_v21  ;;  %643 = vmatpush.bf16.msrb.mxu2 %v1156_v25  ;;  %v1371_v25 = vld [vmem:[#allocation11 + $0xb0] sm:$0xf] }
  0x5d   :  { %681 = vmatpush.bf16.msra.mxu1 %v1232_v3  ;;  %656 = vmatpush.bf16.msrb.mxu3 %v1220_v13  ;;  %v1328_v3 = vor.u32 %v1487_v62, %v1325_v1  ;;  %v1372_v28 = vor.u32 %v1500_v26, %v1371_v25  ;;  %v1494_v62 = vld [vmem:[#allocation11 + $0x84] sm:$0xf0]  ;;  %v1349_v1 = vld [vmem:[#allocation11 + $0x88] sm:$0xf0] }
  0x5e   :  { %v1348_v0 = vor.u32 %v1494_v62, %v1347_v61 }
  0x60   :  { %669 = vmatpush.bf16.msra.mxu0 %v1160_v27  ;;  %v1499_v27 = vld [vmem:[#allocation11 + $0xb4] sm:$0xf] }
  0x61   :  { %682 = vmatpush.bf16.msra.mxu1 %v1224_v15  ;;  %v1376_v30 = vor.u32 %v1499_v27, %v1373_v29 }
  0xa0   :  { %v163_v46 = vpop.f32.mrf.mxu0 }
  0xa1   :  { %v164_v47 = vadd.f32 %v163_v46, %v126_v43  ;;  %v1400_v43 = vor.u32 %v1505_v36, %v1397_v37  ;;  %v1387_v46 = vld [vmem:[#allocation11 + $0xd0] sm:$0xf]  ;;  %v1363_v36 = vld [vmem:[#allocation11 + $0xa0] sm:$0xf]  ;;  %v1498_v37 = vld [vmem:[#allocation11 + $0xa4] sm:$0xf0] }
  0xa3   :  { %v176_v48 = vpop.f32.mrf.mxu1  ;;  %v180_v50 = vmax.f32 %v164_v47, 0.0  ;;  %v1504_v47 = vld [vmem:[#allocation11 + $0xd4] sm:$0xf0] }
  0xa4   :  { %v177_v49 = vadd.f32 %v176_v48, %v127_v45  ;;  %v1344_v45 = vor.u32 %v1491_v41, %v1341_v42  ;;  %v1503_v48 = vld [vmem:[#allocation11 + $0xd4] sm:$0xf]  ;;  %v1365_v41 = vld [vmem:[#allocation11 + $0xa8] sm:$0xf0] }
  0xa5   :  { %v182_v52 = vpack.c.bf16 %v180_v50, %v180_v50  ;;  %v1331_v50 = vld [vmem:[#allocation11 + $0x60] sm:$0xf]  ;;  %v1368_v42 = vor.u32 %v1497_v40, %v1365_v41 }
  0xa6   :  { %v181_v51 = vmax.f32 %v177_v49, 0.0  ;;  %v1389_v49 = vld [vmem:[#allocation11 + $0xd8] sm:$0xf0] }
  0xa7   :  { %390 = vmatmul.bf16.vlgmr.msra.gmra.mxu2 %v182_v52  ;;  %416 = vmatmul.bf16.vlgmr.msrb.gmra.mxu0 %v182_v52  ;;  %v1392_v59 = vor.u32 %v1503_v48, %v1389_v49  ;;  %v1355_v49 = vld [vmem:[#allocation11 + $0x90] sm:$0xf] }
  0xa8   :  { %v183_v53 = vpack.c.bf16 %v181_v51, %v181_v51  ;;  %v165_v54 = vpop.f32.mrf.mxu0  ;;  %v1490_v51 = vld [vmem:[#allocation11 + $0x64] sm:$0xf0]  ;;  %890 = vmatpush.bf16.msra.mxu2 %v1340_v44  ;;  %916 = vmatpush.bf16.msrb.mxu0 %v1344_v45  ;;  %v1484_v44 = vld [vmem:[#allocation11 + $0x34] sm:$0xf0]  ;;  %v1483_v45 = vld [vmem:[#allocation11 + $0x34] sm:$0xf] }
  0xa9   :  { %v1332_v52 = vor.u32 %v1490_v51, %v1331_v50  ;;  %v1333_v54 = vld [vmem:[#allocation11 + $0x68] sm:$0xf0]  ;;  %v1496_v50 = vld [vmem:[#allocation11 + $0x94] sm:$0xf0] }
  0xaa   :  { %403 = vmatmul.bf16.vlgmr.msra.gmra.mxu3 %v183_v53  ;;  %429 = vmatmul.bf16.vlgmr.msrb.gmra.mxu1 %v183_v53  ;;  %v1489_v53 = vld [vmem:[#allocation11 + $0x64] sm:$0xf]  ;;  %v1356_v51 = vor.u32 %v1496_v50, %v1355_v49 }
  0xab   :  { %v178_v55 = vpop.f32.mrf.mxu1  ;;  %903 = vmatpush.bf16.msra.mxu3 %v1404_v31  ;;  %929 = vmatpush.bf16.msrb.mxu1 %v1408_v35  ;;  %v1336_v56 = vor.u32 %v1489_v53, %v1333_v54  ;;  %v1315_v31 = vld [vmem:[#allocation11 + $0x40] sm:$0xf]  ;;  %v1317_v35 = vld [vmem:[#allocation11 + $0x48] sm:$0xf0]  ;;  %v1357_v53 = vld [vmem:[#allocation11 + $0x98] sm:$0xf0] }
  0xac   :  { %v1388_v55 = vor.u32 %v1504_v47, %v1387_v46  ;;  %891 = vmatpush.bf16.msra.mxu2 %v1332_v52  ;;  %v1316_v34 = vor.u32 %v1486_v32, %v1315_v31  ;;  %v1320_v38 = vor.u32 %v1485_v33, %v1317_v35  ;;  %v1309_v47 = vld [vmem:[#allocation11 + $0x38] sm:$0xf0]  ;;  %v1495_v52 = vld [vmem:[#allocation11 + $0x94] sm:$0xf] }
  0xad   :  { %917 = vmatpush.bf16.msrb.mxu0 %v1336_v56  ;;  %v1312_v48 = vor.u32 %v1483_v45, %v1309_v47  ;;  %v1360_v54 = vor.u32 %v1495_v52, %v1357_v53  ;;  %v1482_v56 = vld [vmem:[#allocation11 + $0x24] sm:$0xf0]  ;;  %v947_v35 = vld [vmem:[#allocation2] sm:$0x1] }
  0xaf   :  { %904 = vmatpush.bf16.msra.mxu3 %v1396_v39  ;;  %930 = vmatpush.bf16.msrb.mxu1 %v1400_v43  ;;  %v1364_v39 = vor.u32 %v1498_v37, %v1363_v36  ;;  %v1307_v43 = vld [vmem:[#allocation11 + $0x30] sm:$0xf]  ;;  %v1678_v36 = vmov 0  }
  0xb0   :  { %892 = vmatpush.bf16.msra.mxu2 %v1324_v2  ;;  %v1308_v46 = vor.u32 %v1484_v44, %v1307_v43  ;;  %v1352_v2 = vor.u32 %v1493_v63, %v1349_v1  ;;  %1518 = vset.pattern.permute.xlu0 %v1678_v36 }
  0xb1   :  { %918 = vmatpush.bf16.msrb.mxu0 %v1328_v3  ;;  %v1291_v3 = vld [vmem:[#allocation11 + $0x10] sm:$0xf]  ;;  %950 = vperm.xlu0 %1518, %v947_v35  }
  0xb3   :  { %905 = vmatpush.bf16.msra.mxu3 %v1388_v55  ;;  %931 = vmatpush.bf16.msrb.mxu1 %v1392_v59  ;;  %v1299_v55 = vld [vmem:[#allocation11 + $0x20] sm:$0xf]  ;;  %v1301_v59 = vld [vmem:[#allocation11 + $0x28] sm:$0xf0] }
  0xb4   :  { %893 = vmatpush.bf16.msra.mxu2 %v1316_v34  ;;  %v1300_v58 = vor.u32 %v1482_v56, %v1299_v55  ;;  %v1304_v60 = vor.u32 %v1481_v57, %v1301_v59  ;;  %v944_v34 = vld [vmem:[%s1787_s9] sm:$0x3] }
  0xb5   :  { %919 = vmatpush.bf16.msrb.mxu0 %v1320_v38  ;;  %955 = vst [vmem:[#allocation1] ss:$9 sm:$0xff] %v944_v34  ;;  %v724_v38 = vld [vmem:[%s1786_s8] sm:$0x3]  ;;  %s1679_s8 = smov [#allocation12]  }
  0xb6   :  { %v726_v45 = vperm.slane %v724_v38, 0  ;;  %s993_s9 = sshll.u32 %s1679_s8, 4  ;;  %s994_s9 = int_to_ptr.vmem [resolvable:$true] %s993_s9 }
  0xb7   :  { %906 = vmatpush.bf16.msra.mxu3 %v1380_v5  ;;  %932 = vmatpush.bf16.msrb.mxu1 %v1384_v6  ;;  %v1292_v5 = vor.u32 %v1480_v4, %v1291_v3  ;;  %v1479_v6 = vld [vmem:[#allocation11 + $0x14] sm:$0xf] }
  0xb8   :  { %894 = vmatpush.bf16.msra.mxu2 %v1308_v46 }
  0xb9   :  { %920 = vmatpush.bf16.msrb.mxu0 %v1312_v48 }
  0xbb   :  { %907 = vmatpush.bf16.msra.mxu3 %v1372_v28  ;;  %933 = vmatpush.bf16.msrb.mxu1 %v1376_v30 }
  0xbc   :  { %895 = vmatpush.bf16.msra.mxu2 %v1300_v58  ;;  %v957_v55 = vld [vmem:[#allocation1 + $0x9] sm:$0xff]  ;;  %v956_v57 = vld [vmem:[#allocation1] sm:$0xff] }
  0xbd   :  { %921 = vmatpush.bf16.msrb.mxu0 %v1304_v60 }
  0xbf   :  { %908 = vmatpush.bf16.msra.mxu3 %v1364_v39  ;;  %934 = vmatpush.bf16.msrb.mxu1 %v1368_v42  ;;  %v727_v39 = vperm.slane %v724_v38, 1 }
  0xc0   :  { %896 = vmatpush.bf16.msra.mxu2 %v1292_v5 }
  0xc3   :  { %909 = vmatpush.bf16.msra.mxu3 %v1356_v51  ;;  %935 = vmatpush.bf16.msrb.mxu1 %v1360_v54 }
  0xc7   :  { %910 = vmatpush.bf16.msra.mxu3 %v1348_v0  ;;  %936 = vmatpush.bf16.msrb.mxu1 %v1352_v2 }
 0x123   :  { %v951_v59 = vpop.permute.xlu0 %950 }
 0x124   :  { %v417_v8 = vpop.f32.mrf.mxu0  ;;  %v953_v60 = vperm.slane %v951_v59, 0 }
 0x125   :  { %v418_v9 = vadd.f32 %v417_v8, %v219_v7  ;;  %v1293_v7 = vld [vmem:[#allocation11 + $0x18] sm:$0xf0] }
 0x126   :  { %v1296_v8 = vor.u32 %v1479_v6, %v1293_v7 }
 0x127   :  { %v430_v10 = vpop.f32.mrf.mxu1 }
 0x128   :  { %v431_v11 = vadd.f32 %v430_v10, %v418_v9  ;;  %922 = vmatpush.bf16.msrb.mxu0 %v1296_v8  ;;  %v1283_v9 = vld [vmem:[#allocation11] sm:$0xf]  ;;  %v1478_v10 = vld [vmem:[#allocation11 + $0x4] sm:$0xf0] }
 0x12a   :  { %v435_v13 = vmax.f32 %v431_v11, 0.0  ;;  %v391_v14 = vpop.f32.mrf.mxu2  ;;  %v1477_v11 = vld [vmem:[#allocation11 + $0x4] sm:$0xf] }
 0x12b   :  { %v392_v16 = vadd.f32 %v391_v14, %v218_v12  ;;  %v1284_v12 = vor.u32 %v1478_v10, %v1283_v9 }
 0x12c   :  { %v437_v15 = vpack.c.bf16 %v435_v13, %v435_v13  ;;  %v419_v18 = vpop.f32.mrf.mxu0  ;;  %v1285_v13 = vld [vmem:[#allocation11 + $0x8] sm:$0xf0] }
 0x12d   :  { %v404_v17 = vpop.f32.mrf.mxu3  ;;  %v1288_v14 = vor.u32 %v1477_v11, %v1285_v13  ;;  %897 = vmatpush.bf16.msra.mxu2 %v1284_v12 }
 0x12e   :  { %v405_v19 = vadd.f32 %v404_v17, %v392_v16  ;;  %657 = vmatmul.bf16.vlgmr.msrb.gmra.mxu3 %v437_v15  ;;  %683 = vmatmul.bf16.vlgmr.msra.gmra.mxu1 %v437_v15  ;;  %v470_v16 = vld [vmem:[%s1784_s6] sm:$0x3] }
 0x12f   :  { %v432_v20 = vpop.f32.mrf.mxu1  ;;  %923 = vmatpush.bf16.msrb.mxu0 %v1288_v14  ;;  %v473_v17 = vperm.slane %v470_v16, 1 }
 0x130   :  { %v434_v21 = vmax.f32 %v405_v19, 0.0 }
 0x132   :  { %v436_v22 = vpack.c.bf16 %v434_v21, %v434_v21  ;;  %v393_v23 = vpop.f32.mrf.mxu2 }
 0x133   :  { %v472_v23 = vperm.slane %v470_v16, 0 }
 0x134   :  { %644 = vmatmul.bf16.vlgmr.msrb.gmra.mxu2 %v436_v22  ;;  %670 = vmatmul.bf16.vlgmr.msra.gmra.mxu0 %v436_v22 }
 0x135   :  { %v406_v24 = vpop.f32.mrf.mxu3 }
 0x1ab   :  { %v684_v15 = vpop.f32.mrf.mxu1 }
 0x1b1   :  { %v658_v18 = vpop.f32.mrf.mxu3  ;;  %v671_v19 = vpop.f32.mrf.mxu0 }
 0x1b2   :  { %v672_v20 = vadd.f32 %v671_v19, %v473_v17 }
 0x1b3   :  { %v686_v21 = vpop.f32.mrf.mxu1 }
 0x1b4   :  { %v685_v22 = vadd.f32 %v684_v15, %v672_v20 }
 0x1b6   :  { %v689_v24 = vmax.f32 %v685_v22, 0.0 }
 0x1b7   :  { %v645_v25 = vpop.f32.mrf.mxu2 }
 0x1b8   :  { %v691_v26 = vpack.c.bf16 %v689_v24, %v689_v24  ;;  %v646_v27 = vadd.f32 %v645_v25, %v472_v23 }
 0x1b9   :  { %v660_v28 = vpop.f32.mrf.mxu3  ;;  %v673_v29 = vpop.f32.mrf.mxu0 }
 0x1ba   :  { %v659_v30 = vadd.f32 %v658_v18, %v646_v27  ;;  %911 = vmatmul.bf16.vlgmr.msra.gmra.mxu3 %v691_v26  ;;  %937 = vmatmul.bf16.vlgmr.msrb.gmra.mxu1 %v691_v26 }
 0x1bc   :  { %v688_v31 = vmax.f32 %v659_v30, 0.0 }
 0x1be   :  { %v690_v32 = vpack.c.bf16 %v688_v31, %v688_v31 }
 0x1bf   :  { %v647_v33 = vpop.f32.mrf.mxu2 }
 0x1c0   :  { %898 = vmatmul.bf16.vlgmr.msra.gmra.mxu2 %v690_v32  ;;  %924 = vmatmul.bf16.vlgmr.msrb.gmra.mxu0 %v690_v32 }
 0x237   :  { %v938_v37 = vpop.f32.mrf.mxu1 }
 0x23d   :  { %v912_v40 = vpop.f32.mrf.mxu3  ;;  %v925_v41 = vpop.f32.mrf.mxu0 }
 0x23e   :  { %v926_v42 = vadd.f32 %v925_v41, %v727_v39 }
 0x23f   :  { %v940_v43 = vpop.f32.mrf.mxu1 }
 0x240   :  { %v939_v44 = vadd.f32 %v938_v37, %v926_v42 }
 0x242   :  { %v943_v46 = vmax.f32 %v939_v44, 0.0 }
 0x243   :  { %v899_v47 = vpop.f32.mrf.mxu2 }
 0x244   :  { %v946_v48 = vpack.c.bf16 %v943_v46, %v943_v46  ;;  %v900_v49 = vadd.f32 %v899_v47, %v726_v45 }
 0x245   :  { %v914_v50 = vpop.f32.mrf.mxu3  ;;  %v927_v51 = vpop.f32.mrf.mxu0 }
 0x246   :  { %v913_v52 = vadd.f32 %v912_v40, %v900_v49  ;;  %980 = vmatpush.bf16.xpose.msrb.mxu3 %v946_v48 }
 0x248   :  { %v942_v53 = vmax.f32 %v913_v52, 0.0 }
 0x24a   :  { %v945_v54 = vpack.c.bf16 %v942_v53, %v942_v53 }
 0x24b   :  { %v901_v56 = vpop.f32.mrf.mxu2 }
 0x24c   :  { %967 = vmatpush.bf16.xpose.msrb.mxu2 %v945_v54 }
 0x24d   :  { %981 = vmatmul.bf16.vlgmr.msrb.gmra.mxu3 %v957_v55 }
 0x253   :  { %968 = vmatmul.bf16.vlgmr.msrb.gmra.mxu2 %v956_v57 }
 0x2d0   :  { %v982_v58 = vpop.f32.mrf.mxu3 }
 0x2d6   :  { %v969_v61 = vpop.f32.mrf.mxu2 }
 0x2d7   :  { %v970_v62 = vadd.f32 %v969_v61, %v953_v60 }
 0x2d8   :  { %v984_v63 = vpop.f32.mrf.mxu3 }
 0x2d9   :  { %v983_v0 = vadd.f32 %v982_v58, %v970_v62 }
 0x2db   :  { %987 = vst.msk [vmem:[#allocation12] sm:$0x1] %vm986_vm1, %v983_v0 }
 0x2dc   :  { %998 = dma.vmem_to_hbm [thread:$0]  %s994_s9, 16, %s996_s29, [#allocation5]  }
 0x2de   :  { %v971_v1 = vpop.f32.mrf.mxu2 }
 0x2df   :  { %1669 = dma.done.wait [#allocation5], 16  }
 0x2e0   :  { %1670 = vsyncadd [#allocation5], 4294967280 }
 0x2e1   :  { %1003 = vsyncpa [#allocation4], 1 }
 0x2e2   :  { %1004 = vsyncpa [#allocation7], 1 }
 0x2e3   :  { %1005 = vsyncpa [#allocation10], 1 }
 0x2e4   :  { %1006 = vsyncpa [#allocation5], 1 }

</bundles_post_ra>
